<compile_context>
chip_gen: v7x
topology: tpu7x:2x2x1
jax: 0.10.0
libtpu: 0.0.40
codegen_flags: <defaults>
</compile_context>

<pallas_src>
import functools

import jax
import jax.numpy as jnp
from jax.experimental import pallas as pl
from jax.experimental.pallas import tpu as pltpu


def _wrmse_kernel(params_ref, std_dip_ref, y_ref, yp_ref, out_ref, acc_sc,
                  *, n_total, tile_n, tiles_per_shard):
    """One streaming pass over (C, N) slabs.

    params_ref  : SMEM (3,)  = [std_E, dwt + mean_E - en_min, dwt]
    std_dip_ref : VMEM (3,1) = y_std[1:4] column (lane-broadcast)
    y_ref       : VMEM (4, tile_n)
    yp_ref      : VMEM (3, tile_n)
    out_ref     : VMEM (1, 1, 1) per-shard partial weighted-SSE
    acc_sc      : VMEM (1, tile_n) vector accumulator (persists over t)
    """
    s = pl.program_id(0)          # shard (parallel)
    t = pl.program_id(1)          # tile within shard (arbitrary / reduction)

    @pl.when(t == 0)
    def _init():
        acc_sc[...] = jnp.zeros_like(acc_sc)

    std_e = params_ref[0]
    base = params_ref[1]          # dwt + mean_E - en_min
    dwt = params_ref[2]

    # weights: dwt / (dwt + en - en_min)  ==  dwt / (y0 * std_E + base)
    en_shift = y_ref[0:1, :] * std_e + base               # (1, tile_n)
    w = dwt / en_shift                                     # (1, tile_n)

    # dipole error (the +mean terms cancel): dd = (y_dip - y_pred) * std_dip
    dd = (y_ref[1:4, :] - yp_ref[...]) * std_dip_ref[...]  # (3, tile_n)
    ssq = jnp.sum(dd * dd, axis=0, keepdims=True)          # (1, tile_n)

    # mask lanes beyond N (partial last tile / clamped out-of-range shard tiles)
    tile_idx = s * tiles_per_shard + t
    lane = jax.lax.broadcasted_iota(jnp.int32, (1, tile_n), 1)
    valid = (tile_idx * tile_n + lane) < n_total

    acc_sc[...] += jnp.where(valid, w * ssq, 0.0)

    @pl.when(t == tiles_per_shard - 1)
    def _emit():
        # single cross-lane reduce per shard, done once at finalize
        out_ref[...] = jnp.sum(acc_sc[...], axis=1, keepdims=True).reshape(1, 1, 1)


def wrmse_loss_ratio_dipole_cm(y_cm, y_pred_cm, y_mean, y_std, dwt=1.0,
                               tile_n=8192, n_shards=2):
    """Channel-major entry point: y_cm (4, N), y_pred_cm (3, N)."""
    c, n = y_cm.shape
    assert c == 4 and y_pred_cm.shape == (3, n)

    y_cm = jnp.asarray(y_cm, jnp.float32)
    yp_cm = jnp.asarray(y_pred_cm, jnp.float32)
    mean = jnp.asarray(y_mean, jnp.float32)
    std = jnp.asarray(y_std, jnp.float32)
    dwt_f = jnp.float32(dwt)

    # Global energy min: trivial reduce over the contiguous energy row, done by
    # XLA here so the kernel needs only one pass over the data.
    en_min = jnp.min(y_cm[0] * std[0] + mean[0])
    base = dwt_f + mean[0] - en_min
    params = jnp.stack([std[0], base, dwt_f])           # (3,)  -> SMEM
    std_dip = std[1:].reshape(3, 1)                     # (3,1) -> VMEM column

    # tile / grid geometry (lane mask handles any N; no divisibility required)
    tile_n = max(128, (int(tile_n) // 128) * 128)
    tile_n_eff = min(tile_n, pl.cdiv(n, 128) * 128)
    nt = pl.cdiv(n, tile_n_eff)
    shards = max(1, min(int(n_shards), nt))
    tiles_per_shard = pl.cdiv(nt, shards)

    def tile_map(sh, t):
        # Clamp over-allocated shard tiles to a valid block; the in-kernel
        # lane mask zeroes their contribution.
        return (0, jnp.minimum(sh * tiles_per_shard + t, nt - 1))

    grid_spec = pltpu.PrefetchScalarGridSpec(
        num_scalar_prefetch=0,
        grid=(shards, tiles_per_shard),
        in_specs=[
            pl.BlockSpec(memory_space=pltpu.MemorySpace.SMEM),   # params
            pl.BlockSpec((3, 1), lambda sh, t: (0, 0)),          # std_dip
            pl.BlockSpec((4, tile_n_eff), tile_map),             # y      (C, N)
            pl.BlockSpec((3, tile_n_eff), tile_map),             # y_pred (C, N)
        ],
        out_specs=pl.BlockSpec((1, 1, 1), lambda sh, t: (sh, 0, 0)),
        scratch_shapes=[pltpu.VMEM((1, tile_n_eff), jnp.float32)],
    )

    partials = pl.pallas_call(
        functools.partial(_wrmse_kernel, n_total=n, tile_n=tile_n_eff,
                          tiles_per_shard=tiles_per_shard),
        out_shape=jax.ShapeDtypeStruct((shards, 1, 1), jnp.float32),
        grid_spec=grid_spec,
        compiler_params=pltpu.CompilerParams(
            dimension_semantics=("parallel", "arbitrary")),
    )(params, std_dip, y_cm, yp_cm)

    wmse = jnp.sum(partials[:, 0, 0]) / jnp.float32(n)
    return 1000.0 * jnp.sqrt(wmse)


def wrmse_loss_ratio_dipole(y, y_pred, y_mean, y_std, dwt=1.0, **kwargs):
    """PyTorch-layout entry: y (N,4), y_pred (N,3).  Transposes once; prefer
    producing (C, N) slabs upstream and calling wrmse_loss_ratio_dipole_cm."""
    return wrmse_loss_ratio_dipole_cm(
        jnp.asarray(y, jnp.float32).T,
        jnp.asarray(y_pred, jnp.float32).T,
        y_mean, y_std, dwt=dwt, **kwargs)


def _reference(y, y_pred, y_mean, y_std, dwt=1.0):
    """Pure-JAX transliteration of the PyTorch forward (for validation)."""
    dip_pred = y_pred * y_std[1:] + y_mean[1:]
    yd = y * y_std + y_mean
    dip = yd[:, 1:]
    en = yd[:, 0]
    en_min = en.min()
    w = dwt / (dwt + en - en_min)
    dd = dip - dip_pred
    wmse = jnp.mean(jnp.sum(dd * dd, axis=1) * w)
    return 1000.0 * jnp.sqrt(wmse)


if __name__ == "__main__":
    key = jax.random.PRNGKey(0)

    # Deterministic "scale" parameters (set_scale in the PyTorch module).
    y_mean = jnp.array([0.5, -0.1, 0.2, 0.05], dtype=jnp.float32)
    y_std = jnp.array([2.0, 1.5, 0.8, 1.2], dtype=jnp.float32)
    dwt = 1.0

    # (N, tile_n, n_shards): single padded tile / even multi-tile multi-shard /
    # uneven tiles with a clamped shard tail.
    configs = [(300, 8192, 2), (2048, 256, 2), (777, 128, 2)]
    for i, (n, tile_n, n_shards) in enumerate(configs):
        k_y, k_p = jax.random.split(jax.random.fold_in(key, i))
        y = jax.random.normal(k_y, (n, 4), dtype=jnp.float32)
        y_pred = jax.random.normal(k_p, (n, 3), dtype=jnp.float32)

        loss = wrmse_loss_ratio_dipole(y, y_pred, y_mean, y_std, dwt=dwt,
                                       tile_n=tile_n, n_shards=n_shards)
        loss = jax.block_until_ready(loss)

        ref = _reference(y, y_pred, y_mean, y_std, dwt=dwt)
        assert jnp.allclose(loss, ref, rtol=2e-5, atol=1e-3), (n, loss, ref)

    print("KERNEL_OK")
</pallas_src>

<mosaic_0001>
module attributes {stable_mosaic.version = 11 : i64} {
  func.func @_wrmse_kernel(%arg0: i32, %arg1: i32, %arg2: memref<3xf32, #tpu.memory_space<smem>>, %arg3: memref<3x1xf32, #tpu.memory_space<vmem>>, %arg4: memref<4x384xf32, #tpu.memory_space<vmem>>, %arg5: memref<3x384xf32, #tpu.memory_space<vmem>>, %arg6: memref<1x1x1xf32, #tpu.memory_space<vmem>>, %arg7: memref<1x384xf32, #tpu.memory_space<vmem>>) attributes {dimension_semantics = [#tpu.dimension_semantics<parallel>, #tpu.dimension_semantics<arbitrary>], iteration_bounds = array<i64: 1, 1>, scalar_prefetch = 0 : i64, scratch_operands = 1 : i64, tpu.core_type = #tpu.core_type<tc>, window_params = [{transform_indices = @transform_0, window_bounds = array<i64: 3>}, {pipeline_mode = #tpu.pipeline_mode<synchronous>, transform_indices = @transform_1, window_bounds = array<i64: 3, 1>}, {transform_indices = @transform_2, window_bounds = array<i64: 4, 384>}, {transform_indices = @transform_3, window_bounds = array<i64: 3, 384>}, {transform_indices = @transform_4, window_bounds = array<i64: 1, 1, 1>}]} {
    %c0_i32 = arith.constant 0 : i32
    %0 = arith.cmpi eq, %arg1, %c0_i32 : i32
    %1 = arith.extui %0 : i1 to i32
    %c0_i32_0 = arith.constant 0 : i32
    %2 = arith.cmpi ne, %1, %c0_i32_0 : i32
    scf.if %2 {
      %cst_16 = arith.constant 0.000000e+00 : f32
      %39 = vector.broadcast %cst_16 : f32 to vector<1x384xf32>
      %c0_17 = arith.constant 0 : index
      %c0_18 = arith.constant 0 : index
      %40 = vector.load %arg7[%c0_17, %c0_18] : memref<1x384xf32, #tpu.memory_space<vmem>>, vector<1x384xf32>
      tpu.vector_store %arg7[%c0_17, %c0_18], %39 {strides = array<i32>} : memref<1x384xf32, #tpu.memory_space<vmem>>, vector<1x384xf32>,
    } else {
    }
    %c0 = arith.constant 0 : index
    %3 = memref.load %arg2[%c0] : memref<3xf32, #tpu.memory_space<smem>>
    %c1 = arith.constant 1 : index
    %4 = memref.load %arg2[%c1] : memref<3xf32, #tpu.memory_space<smem>>
    %c2 = arith.constant 2 : index
    %5 = memref.load %arg2[%c2] : memref<3xf32, #tpu.memory_space<smem>>
    %c0_1 = arith.constant 0 : index
    %c0_2 = arith.constant 0 : index
    %6 = vector.load %arg4[%c0_1, %c0_2] : memref<4x384xf32, #tpu.memory_space<vmem>>, vector<1x384xf32>
    %7 = vector.broadcast %3 : f32 to vector<1x384xf32>
    %8 = arith.mulf %6, %7 : vector<1x384xf32>
    %9 = vector.broadcast %4 : f32 to vector<1x384xf32>
    %10 = arith.addf %8, %9 : vector<1x384xf32>
    %11 = vector.broadcast %5 : f32 to vector<1x384xf32>
    %12 = arith.divf %11, %10 : vector<1x384xf32>
    %c1_3 = arith.constant 1 : index
    %c0_4 = arith.constant 0 : index
    %13 = vector.load %arg4[%c1_3, %c0_4] : memref<4x384xf32, #tpu.memory_space<vmem>>, vector<3x384xf32>
    %c0_5 = arith.constant 0 : index
    %c0_6 = arith.constant 0 : index
    %14 = vector.load %arg5[%c0_5, %c0_6] : memref<3x384xf32, #tpu.memory_space<vmem>>, vector<3x384xf32>
    %15 = arith.subf %13, %14 : vector<3x384xf32>
    %c0_7 = arith.constant 0 : index
    %c0_8 = arith.constant 0 : index
    %16 = vector.load %arg3[%c0_7, %c0_8] : memref<3x1xf32, #tpu.memory_space<vmem>>, vector<3x1xf32>
    %17 = vector.broadcast %16 : vector<3x1xf32> to vector<3x384xf32>
    %18 = arith.mulf %15, %17 : vector<3x384xf32>
    %19 = arith.mulf %18, %18 : vector<3x384xf32>
    %cst = arith.constant dense<0.000000e+00> : vector<384xf32>
    %20 = vector.multi_reduction <add>, %19, %cst [0] : vector<3x384xf32> to vector<384xf32>
    %21 = vector.shape_cast %20 : vector<384xf32> to vector<1x384xf32>
    %c1_i32 = arith.constant 1 : i32
    %22 = arith.muli %arg0, %c1_i32 : i32
    %23 = arith.addi %22, %arg1 : i32
    %24 = tpu.iota {dimensions = array<i32: 1>} : vector<1x384xi32>
    %c384_i32 = arith.constant 384 : i32
    %25 = arith.muli %23, %c384_i32 : i32
    %26 = vector.broadcast %25 : i32 to vector<1x384xi32>
    %27 = arith.addi %26, %24 : vector<1x384xi32>
    %c300_i32 = arith.constant 300 : i32
    %28 = vector.broadcast %c300_i32 : i32 to vector<1x384xi32>
    %29 = arith.cmpi slt, %27, %28 : vector<1x384xi32>
    %c0_9 = arith.constant 0 : index
    %c0_10 = arith.constant 0 : index
    %30 = vector.load %arg7[%c0_9, %c0_10] : memref<1x384xf32, #tpu.memory_space<vmem>>, vector<1x384xf32>
    %31 = arith.mulf %12, %21 : vector<1x384xf32>
    %cst_11 = arith.constant 0.000000e+00 : f32
    %32 = vector.broadcast %cst_11 : f32 to vector<1x384xf32>
    %33 = arith.select %29, %31, %32 : vector<1x384xi1>, vector<1x384xf32>
    %34 = arith.addf %30, %33 : vector<1x384xf32>
    %c0_12 = arith.constant 0 : index
    %c0_13 = arith.constant 0 : index
    %35 = vector.load %arg7[%c0_12, %c0_13] : memref<1x384xf32, #tpu.memory_space<vmem>>, vector<1x384xf32>
    tpu.vector_store %arg7[%c0_12, %c0_13], %34 {strides = array<i32>} : memref<1x384xf32, #tpu.memory_space<vmem>>, vector<1x384xf32>,
    %c0_i32_14 = arith.constant 0 : i32
    %36 = arith.cmpi eq, %arg1, %c0_i32_14 : i32
    %37 = arith.extui %36 : i1 to i32
    %c0_i32_15 = arith.constant 0 : i32
    %38 = arith.cmpi ne, %37, %c0_i32_15 : i32
    scf.if %38 {
      %c0_16 = arith.constant 0 : index
      %c0_17 = arith.constant 0 : index
      %39 = vector.load %arg7[%c0_16, %c0_17] : memref<1x384xf32, #tpu.memory_space<vmem>>, vector<1x384xf32>
      %cst_18 = arith.constant dense<0.000000e+00> : vector<1xf32>
      %40 = vector.multi_reduction <add>, %39, %cst_18 [1] : vector<1x384xf32> to vector<1xf32>
      %41 = vector.shape_cast %40 : vector<1xf32> to vector<1x1xf32>
      %42 = vector.shape_cast %41 : vector<1x1xf32> to vector<1x1x1xf32>
      %c0_19 = arith.constant 0 : index
      %c0_20 = arith.constant 0 : index
      %c0_21 = arith.constant 0 : index
      %43 = vector.load %arg6[%c0_19, %c0_20, %c0_21] : memref<1x1x1xf32, #tpu.memory_space<vmem>>, vector<1x1x1xf32>
      tpu.vector_store %arg6[%c0_19, %c0_20, %c0_21], %42 {strides = array<i32>} : memref<1x1x1xf32, #tpu.memory_space<vmem>>, vector<1x1x1xf32>,
    } else {
    }
    return
  }
  func.func @transform_0(%arg0: i32, %arg1: i32) -> i32 {
    %c0_i32 = arith.constant 0 : i32
    %c0_i32_0 = arith.constant 0 : i32
    return %c0_i32 : i32
  }
  func.func @transform_1(%arg0: i32, %arg1: i32) -> (i32, i32) {
    %c0_i32 = arith.constant 0 : i32
    %c0_i32_0 = arith.constant 0 : i32
    %c0_i32_1 = arith.constant 0 : i32
    return %c0_i32, %c0_i32_0 : i32, i32
  }
  func.func @transform_2(%arg0: i32, %arg1: i32) -> (i32, i32) {
    %c1_i32 = arith.constant 1 : i32
    %0 = arith.muli %arg0, %c1_i32 : i32
    %1 = arith.addi %0, %arg1 : i32
    %c0_i32 = arith.constant 0 : i32
    %2 = arith.minsi %1, %c0_i32 : i32
    %c0_i32_0 = arith.constant 0 : i32
    %c0_i32_1 = arith.constant 0 : i32
    return %c0_i32_0, %2 : i32, i32
  }
  func.func @transform_3(%arg0: i32, %arg1: i32) -> (i32, i32) {
    %c1_i32 = arith.constant 1 : i32
    %0 = arith.muli %arg0, %c1_i32 : i32
    %1 = arith.addi %0, %arg1 : i32
    %c0_i32 = arith.constant 0 : i32
    %2 = arith.minsi %1, %c0_i32 : i32
    %c0_i32_0 = arith.constant 0 : i32
    %c0_i32_1 = arith.constant 0 : i32
    return %c0_i32_0, %2 : i32, i32
  }
  func.func @transform_4(%arg0: i32, %arg1: i32) -> (i32, i32, i32) {
    %c0_i32 = arith.constant 0 : i32
    %c0_i32_0 = arith.constant 0 : i32
    %c0_i32_1 = arith.constant 0 : i32
    return %arg0, %c0_i32, %c0_i32_0 : i32, i32, i32
  }
}

</mosaic_0001>

<bundles_post_ra>
// kernel: tpu_custom_call.1
= control target key start
LH: loop header
LB: loop body
LE: loop exit
PB: predicated region body
PF: predicated region fallthrough
CT: control target
= control target key end

     0   :  { %9 = vsyncpa [#allocation6], 0  ;;  %s482_s0 = inlined_call_operand.hbm [shape: f32[3], index: 0, kind: input, shape index: {}]   ;;  %s483_s1 = inlined_call_operand.vmem [shape: f32[3,1], index: 1, kind: input, shape index: {}]   ;;  %s484_s2 = inlined_call_operand.vmem [shape: f32[4,300], index: 2, kind: input, shape index: {}]   ;;  %s485_s3 = inlined_call_operand.hbm [shape: f32[3,300], index: 3, kind: input, shape index: {}]   ;;  %s486_s4 = inlined_call_operand.hbm [shape: f32[1,1,1], index: 4, kind: output, shape index: {}]  }
   0x1   :  { %10 = vsyncpa [#allocation4], 0 }
   0x2   :  { %11 = vsyncpa [#allocation5], 0  ;;  %s324_s17 = scalar_lea.hbm %s482_s0, 16 }
   0x3   :  { %p325_p0 = scmp.ne.s32.totalorder %s482_s0, %s324_s17  ;;  %p328_p1 = scmp.lt.u32.totalorder %s324_s17, %s482_s0 }
   0x5   :  { %p330_p2 = pnand %p328_p1, %p325_p0 }
   0x7   :  { %333 = shalt.err (!%p330_p2)
}
   0x8   :  { %s384_s22 = smov [#allocation3]   ;;  %s385_s25 = smov [#allocation7]  }
   0x9   :  { %19 = dma.hbm_to_smem %s482_s0, 16, %s384_s22, [#allocation6]  }
   0xa   :  { %s48_s26 = sshll.u32 %s385_s25, 4  ;;  %s334_s29 = scalar_lea.hbm %s485_s3, 192  ;;  %s49_s26 = int_to_ptr.vmem [resolvable:$true] %s48_s26 }
   0xb   :  { %p335_p3 = scmp.ne.s32.totalorder %s485_s3, %s334_s29  ;;  %p338_p4 = scmp.lt.u32.totalorder %s334_s29, %s485_s3 }
   0xd   :  { %p340_p5 = pnand %p338_p4, %p335_p3 }
   0xf   :  { %343 = shalt.err (!%p340_p5)
}
  0x10   :  { %s344_s8 = scalar_lea.vmem %s49_s26, 192  ;;  %p349_p7 = scmp.lt.s32.totalorder %s49_s26, %s49_s26 }
  0x11   :  { %p345_p6 = scmp.ne.s32.totalorder %s49_s26, %s344_s8  ;;  %p350_p8 = scmp.lt.s32.totalorder %s344_s8, %s344_s8 }
  0x13   :  { %p351_p9 = por %p350_p8, %p349_p7 }
  0x15   :  { %p352_p10 = pnand %p351_p9, %p345_p6 }
  0x17   :  { %355 = shalt.err (!%p352_p10)
}
  0x18   :  { %51 = dma.hbm_to_vmem [thread:$0]  %s485_s3, 192, %s49_s26, [#allocation4]  }
  0x19   :  { %378 = dma.done.wait [#allocation6], 16  }
  0x1a   :  { %379 = vsyncadd [#allocation6], 4294967280 }
  0x1b   :  { %380 = dma.done.wait [#allocation4], 192  }
  0x1c   :  { %381 = vsyncadd [#allocation4], 4294967104 }
  0x1d   :  { %58 = sfence }
  0x1e   :  { %v115_v0 = vld [vmem:[%s483_s1] sm:$0x7]  ;;  %v87_v1 = vlaneseq  ;;  %v386_v2 = vmov 0   ;;  %v387_v4 = vmov 0.0   ;;  %v388_v5 = vmov 839922192  }
  0x1f   :  { %321 = vset.pattern.permute.xlu0 %v386_v2  ;;  %v121_v6 = vunpack.c.l.s4 %v388_v5  ;;  %v105_v9 = vld [vmem:[#allocation7] sm:$0x77]  ;;  %v106_v10 = vld [vmem:[#allocation7 + $0x8] sm:$0x7]  ;;  %s92_s14 = sld [smem:[#allocation3]]  ;;  %s312_s15 = sld [smem:[#allocation3 + $0x1]] }
  0x20   :  { %118 = vperm.xlu0 %321, %v115_v0   ;;  %vm444_vm0 = vcmp.lt.s32.totalorder %v87_v1, 384  ;;  %v451_v8 = vshrl.u32 %v87_v1, 7  ;;  %v109_v11 = vrot.slane %v105_v9, 7  ;;  %v110_v12 = vrot.slane %v106_v10, 7  ;;  %v103_v14 = vld [vmem:[%s484_s2] sm:$0xee] }
  0x21   :  { %91 = vst.msk [vmem:[#allocation2] sm:$0x7] %vm444_vm0, %v387_v4  ;;  %v122_v7 = vunpack.c.0.s8 %v121_v6  ;;  %v104_v15 = vld [vmem:[%s484_s2 + $0x8] sm:$0xe]  ;;  %vm142_vm1 = vcmask 1042432   ;;  %v166_v62 = vand.u32 127, %v87_v1 }
  0x22   :  { %v113_v17 = vsub.f32 %v103_v14, %v109_v11  ;;  %v114_v18 = vsub.f32 %v104_v15, %v110_v12  ;;  %v95_v23 = vld [vmem:[%s484_s2] ss:$4 sm:$0x7]  ;;  %v389_v42 = vmov 1966171168   ;;  %s313_s2 = sld [smem:[#allocation3 + $0x2]] }
  0x23   :  { %v125_v13 = vsub.s32 %v122_v7, %v451_v8  ;;  %v183_v43 = vunpack.c.l.s4 %v389_v42  ;;  %v168_v5 = vadd.s32 256, %v166_v62  ;;  %v209_v7 = vsub.s32 0, %v451_v8  ;;  %s390_s18 = smov [#allocation8]  }
  0x24   :  { %v213_v9 = vsub.s32 1, %v451_v8  ;;  %v217_v10 = vsub.s32 2, %v451_v8  ;;  %vm278_vm3 = vcmask 1040384   ;;  %s294_s19 = sshll.u32 %s390_s18, 4  ;;  %vm286_vm4 = vcmask 0   ;;  %s295_s19 = int_to_ptr.vmem [resolvable:$true] %s294_s19 }
  0x25   :  { %v96_v24 = vstv %s92_s14  ;;  %v98_v31 = vstv %s312_s15  ;;  %v184_v50 = vunpack.c.0.s8 %v183_v43  ;;  %vm176_vm2 = vcmp.lt.s32.totalorder %v168_v5, 300  ;;  %s356_s20 = scalar_lea.vmem %s295_s19, 16  ;;  %s360_s21 = scalar_lea.vmem %s295_s19, 32 }
  0x26   :  { %v97_v30 = vmul.f32 %v96_v24, %v95_v23  ;;  %p357_p11 = scmp.ne.s32.totalorder %s295_s19, %s356_s20  ;;  %p361_p12 = scmp.lt.s32.totalorder %s295_s19, %s295_s19 }
  0x27   :  { %v187_v58 = vsub.s32 %v184_v50, %v451_v8  ;;  %p362_p13 = scmp.lt.s32.totalorder %s360_s21, %s356_s20 }
  0x28   :  { %v99_v38 = vadd.f32 %v98_v31, %v97_v30  ;;  %v100_v61 = vstv %s313_s2 }
  0x29   :  { %p363_p0 = por %p362_p13, %p361_p12 }
  0x2a   :  { %322 = vrcp.f32 %v99_v38 }
  0x2b   :  { %p364_p1 = pnand %p363_p0, %p357_p11 }
  0x34   :  { %v323_v60 = vpop.eup %322 }
  0x35   :  { %v102_v4 = vmul.f32 %v323_v60, %v100_v61 }
  0x9f   :  { %v119_v16 = vpop.permute.xlu0 %118 }
  0xa0   :  { %v126_v19 = vrot.slane %v119_v16, %v125_v13 }
  0xa2   :  { %v127_v20 = vrot.slane %v126_v19, 7  ;;  %v177_v19 = vld [vmem:[#allocation2] sm:$0x7] }
  0xa4   :  { %v129_v21 = vmul.f32 %v127_v20, %v113_v17  ;;  %v130_v22 = vmul.f32 %v127_v20, %v114_v18 }
  0xa6   :  { %v131_v25 = vmul.f32 %v129_v21, %v129_v21  ;;  %v132_v26 = vmul.f32 %v130_v22, %v130_v22 }
  0xa8   :  { %v135_v27 = vcombine.high %v131_v25, %v131_v25  ;;  %v136_v28 = vrot.slane %v131_v25, 1  ;;  %v138_v29 = vrot.slane %v132_v26, 1 }
  0xaa   :  { %v137_v32 = vrot.slane %v135_v27, 1  ;;  %v143_v33 = vsel %vm142_vm1, %v136_v28, 0.0  ;;  %v157_v34 = vsel %vm142_vm1, %v138_v29, 0.0 }
  0xab   :  { %v144_v35 = vrot.slane %v143_v33, 4  ;;  %v158_v36 = vrot.slane %v157_v34, 4 }
  0xac   :  { %v150_v37 = vsel %vm142_vm1, %v137_v32, 0.0 }
  0xad   :  { %v145_v39 = vadd.f32 %v144_v35, %v143_v33  ;;  %v151_v40 = vrot.slane %v150_v37, 4  ;;  %v159_v41 = vadd.f32 %v158_v36, %v157_v34 }
  0xaf   :  { %v146_v44 = vrot.slane %v145_v39, 2  ;;  %v152_v45 = vadd.f32 %v151_v40, %v150_v37  ;;  %v160_v46 = vrot.slane %v159_v41, 2 }
  0xb1   :  { %v147_v47 = vadd.f32 %v146_v44, %v145_v39  ;;  %v153_v48 = vrot.slane %v152_v45, 2  ;;  %v161_v49 = vadd.f32 %v160_v46, %v159_v41 }
  0xb3   :  { %v148_v51 = vrot.slane %v147_v47, 1  ;;  %v154_v52 = vadd.f32 %v153_v48, %v152_v45  ;;  %v162_v53 = vrot.slane %v161_v49, 1 }
  0xb5   :  { %v155_v54 = vrot.slane %v154_v52, 1  ;;  %v149_v55 = vadd.f32 %v148_v51, %v147_v47  ;;  %v163_v57 = vadd.f32 %v162_v53, %v161_v49 }
  0xb7   :  { %v156_v56 = vadd.f32 %v155_v54, %v154_v52  ;;  %v195_v0 = vrot.slane %v163_v57, %v187_v58 }
  0xb9   :  { %v181_v59 = vcombine.low %v149_v55, %v156_v56 }
  0xbb   :  { %v188_v63 = vrot.slane %v181_v59, %v187_v58 }
  0xbd   :  { %v196_v2 = vcombine.low %v188_v63, %v195_v0 }
  0xbf   :  { %v203_v6 = vrot.slane %v196_v2, %v187_v58 }
  0xc1   :  { %v205_v11 = vmul.f32 %v203_v6, %v102_v4 }
  0xc3   :  { %v210_v12 = vrot.slane %v205_v11, %v209_v7  ;;  %v214_v13 = vrot.slane %v205_v11, %v213_v9  ;;  %v218_v14 = vrot.slane %v205_v11, %v217_v10 }
  0xc5   :  { %v224_v15 = vsel %vm176_vm2, %v218_v14, 0.0  ;;  %v228_v16 = vcombine.low %v210_v12, %v214_v13 }
  0xc6   :  { %v242_v1 = vrot.slane %v224_v15, %v187_v58 }
  0xc7   :  { %v235_v17 = vrot.slane %v228_v16, %v187_v58 }
  0xc9   :  { %v243_v18 = vcombine.low %v235_v17, %v242_v1 }
  0xcb   :  { %v250_v20 = vrot.slane %v243_v18, %v187_v58 }
  0xcd   :  { %v252_v21 = vadd.f32 %v250_v20, %v177_v19 }
  0xcf   :  { %257 = vst.msk [vmem:[#allocation2] sm:$0x7] %vm444_vm0, %v252_v21 }
  0xd6   :  { %v261_v22 = vld [vmem:[#allocation2] sm:$0x7] }
  0xd7   :  { %v266_v23 = vrot.slane %v261_v22, %v209_v7  ;;  %v270_v8 = vrot.slane %v261_v22, %v213_v9  ;;  %v274_v24 = vrot.slane %v261_v22, %v217_v10 }
  0xd9   :  { %v279_v25 = vsel %vm278_vm3, %v266_v23, 0.0  ;;  %v280_v26 = vsel %vm278_vm3, %v270_v8, 0.0  ;;  %v282_v28 = vsel %vm278_vm3, %v274_v24, 0.0 }
  0xda   :  { %v281_v27 = vadd.f32 %v280_v26, %v279_v25 }
  0xdc   :  { %v283_v29 = vadd.f32 %v282_v28, %v281_v27 }
  0xde   :  { %284 = vadd.xlane.f32.xlu0 %v283_v29 }
 0x16b   :  { %v285_v30 = vpop.xlane.xlu0 %284 }
 0x16c   :  { %287 = vst.msk [vmem:[#allocation8] sm:$0x1] %vm286_vm4, %v285_v30 }
 0x16d   :  { %367 = shalt.err (!%p364_p1)
}
 0x16e   :  { %s368_s24 = scalar_lea.hbm %s486_s4, 16 }
 0x16f   :  { %p369_p2 = scmp.ne.s32.totalorder %s486_s4, %s368_s24  ;;  %p372_p3 = scmp.lt.u32.totalorder %s368_s24, %s486_s4 }
 0x171   :  { %p374_p4 = pnand %p372_p3, %p369_p2 }
 0x173   :  { %377 = shalt.err (!%p374_p4)
}
 0x174   :  { %297 = dma.vmem_to_hbm [thread:$0]  %s295_s19, 16, %s486_s4, [#allocation5]  }
 0x175   :  { %382 = dma.done.wait [#allocation5], 16  }
 0x176   :  { %383 = vsyncadd [#allocation5], 4294967280 }
 0x177   :  { %301 = vsyncpa [#allocation4], 1 }
 0x178   :  { %302 = vsyncpa [#allocation5], 1 }
 0x179   :  { %303 = vsyncpa [#allocation6], 1 }

</bundles_post_ra>
